<compile_context>
chip_gen: v7x
topology: tpu7x:2x2x1
jax: 0.10.0
libtpu: 0.0.40
codegen_flags: <defaults>
</compile_context>

<pallas_src>
import functools

import jax
import jax.numpy as jnp
import numpy as np
from jax.experimental import pallas as pl
from jax.experimental.pallas import tpu as pltpu

LN_EPS = 1e-5


# ----------------------------------------------------------------------------
# Kernel bodies
# ----------------------------------------------------------------------------
def _layer_norm(v, g, b):
    mu = jnp.mean(v, axis=-1, keepdims=True)
    var = jnp.mean(jnp.square(v - mu), axis=-1, keepdims=True)
    return (v - mu) * jax.lax.rsqrt(var + LN_EPS) * g + b


def ln_qkv_kernel(x_ref, g_ref, b_ref, w_ref, bias_ref, o_ref):
    """LN1 + fused QKV projection for one block of tokens."""
    x = x_ref[...]                                            # (TM, D)   f32
    xn = _layer_norm(x, g_ref[...], b_ref[...])
    y = jnp.dot(xn.astype(jnp.bfloat16), w_ref[...],          # bf16 MXU, f32 acc
                preferred_element_type=jnp.float32)           # (TM, 3D)
    o_ref[...] = (y + bias_ref[...]).astype(o_ref.dtype)


def attention_kernel(q_ref, k_ref, v_ref, o_ref):
    """Softmax attention, all heads batched, one batch element per grid step."""
    q = q_ref[0]                                              # (H, L, hd) bf16
    k = k_ref[0]                                              # q already pre-scaled
    v = v_ref[0]
    s = jnp.einsum("hld,hmd->hlm", q, k,
                   preferred_element_type=jnp.float32)        # (H, L, L) f32
    s = s - jnp.max(s, axis=-1, keepdims=True)
    p = jnp.exp(s)
    denom = jnp.sum(p, axis=-1, keepdims=True)                # (H, L, 1)
    o = jnp.einsum("hlm,hmd->hld", p.astype(q.dtype), v,
                   preferred_element_type=jnp.float32)        # (H, L, hd)
    o_ref[0] = (o / denom).astype(o_ref.dtype)                # normalize small tensor


def proj_mlp_kernel(x_ref, a_ref, wo_ref, bo_ref, g2_ref, b2_ref,
                    wfc_ref, bfc_ref, wpj_ref, bpj_ref, o_ref):
    """attn out-proj + residual, then LN2 + MLP(QuickGELU) + residual."""
    x = x_ref[...]                                            # (TM, D) f32 residual
    a = a_ref[...]                                            # (TM, D) bf16 attn out
    attn = jnp.dot(a, wo_ref[...],
                   preferred_element_type=jnp.float32) + bo_ref[...]
    x = x + attn
    xn2 = _layer_norm(x, g2_ref[...], b2_ref[...])
    h1 = jnp.dot(xn2.astype(jnp.bfloat16), wfc_ref[...],
                 preferred_element_type=jnp.float32) + bfc_ref[...]
    h1 = h1 * jax.nn.sigmoid(1.702 * h1)                      # QuickGELU (f32 VPU/EUP)
    mlp = jnp.dot(h1.astype(jnp.bfloat16), wpj_ref[...],
                  preferred_element_type=jnp.float32) + bpj_ref[...]
    o_ref[...] = x + mlp


# ----------------------------------------------------------------------------
# pallas_call wrappers
# ----------------------------------------------------------------------------
def _full_spec(arr):
    nd = arr.ndim
    return pl.BlockSpec(arr.shape, lambda i, _nd=nd: (0,) * _nd)


def _row_block(T):
    for cand in (1024, 512, 256, 128, 64, 32, 16, 8):
        if T % cand == 0:
            return cand
    return T


def _nbytes(*arrays):
    return sum(int(np.prod(a.shape)) * np.dtype(a.dtype).itemsize for a in arrays)


def _compiler_params(total_bytes):
    # 2x for default double-buffering, +8 MiB headroom, capped for v7x's 64 MiB VMEM.
    limit = int(min(2 * total_bytes + (8 << 20), 64 << 20))
    return pltpu.CompilerParams(dimension_semantics=("parallel",),
                                vmem_limit_bytes=limit)


def ln_qkv_apply(x_td, g, b, w, bias):
    T, D = x_td.shape
    F = w.shape[1]
    tm = _row_block(T)
    return pl.pallas_call(
        ln_qkv_kernel,
        out_shape=jax.ShapeDtypeStruct((T, F), jnp.bfloat16),
        grid=(T // tm,),
        in_specs=[pl.BlockSpec((tm, D), lambda i: (i, 0)),
                  _full_spec(g), _full_spec(b), _full_spec(w), _full_spec(bias)],
        out_specs=pl.BlockSpec((tm, F), lambda i: (i, 0)),
        compiler_params=_compiler_params(_nbytes(x_td, g, b, w, bias) + T * F * 2),
    )(x_td, g, b, w, bias)


def attention_apply(qh, kh, vh):
    N, H, L, hd = qh.shape
    spec = pl.BlockSpec((1, H, L, hd), lambda n: (n, 0, 0, 0))
    scratch_bytes = 4 * H * L * hd * 2 + H * L * L * 4
    return pl.pallas_call(
        attention_kernel,
        out_shape=jax.ShapeDtypeStruct((N, H, L, hd), jnp.bfloat16),
        grid=(N,),
        in_specs=[spec, spec, spec],
        out_specs=spec,
        compiler_params=_compiler_params(scratch_bytes),
    )(qh, kh, vh)


def proj_mlp_apply(x_td, a_td, wo, bo, g2, b2, wfc, bfc, wpj, bpj):
    T, D = x_td.shape
    tm = _row_block(T)
    params = (wo, bo, g2, b2, wfc, bfc, wpj, bpj)
    return pl.pallas_call(
        proj_mlp_kernel,
        out_shape=jax.ShapeDtypeStruct((T, D), jnp.float32),
        grid=(T // tm,),
        in_specs=[pl.BlockSpec((tm, D), lambda i: (i, 0)),
                  pl.BlockSpec((tm, D), lambda i: (i, 0))]
                 + [_full_spec(p) for p in params],
        out_specs=pl.BlockSpec((tm, D), lambda i: (i, 0)),
        compiler_params=_compiler_params(_nbytes(x_td, a_td, *params) + T * D * 4),
    )(x_td, a_td, *params)


def resblock_apply(x_nld, kp, n_head):
    """x_nld: (N, L, D) float32. kp: kernel-layout params (bf16 weights)."""
    N, L, D = x_nld.shape
    hd = D // n_head
    T = N * L
    x_td = x_nld.reshape(T, D)

    # A) LN1 + fused QKV over all tokens (big M for the MXU).
    qkv = ln_qkv_apply(x_td, kp["ln1_g"], kp["ln1_b"], kp["w_qkv"], kp["b_qkv"])

    # Wrapper-side layout plumbing: split heads (XLA, cheap).
    def split_heads(t):
        return t.reshape(N, L, n_head, hd).transpose(0, 2, 1, 3)   # (N, H, L, hd)

    qh = split_heads(qkv[:, :D])
    kh = split_heads(qkv[:, D:2 * D])
    vh = split_heads(qkv[:, 2 * D:])

    # B) batched-head attention, one batch element per (parallel) grid step.
    ah = attention_apply(qh, kh, vh)                               # (N, H, L, hd) bf16
    a_td = ah.transpose(0, 2, 1, 3).reshape(T, D)                  # merge heads, lane-dense

    # C) out-proj + residual + LN2 + MLP + residual over all tokens.
    y_td = proj_mlp_apply(x_td, a_td, kp["w_out"], kp["b_out"],
                          kp["ln2_g"], kp["ln2_b"],
                          kp["w_fc"], kp["b_fc"], kp["w_proj"], kp["b_proj"])
    return y_td.reshape(N, L, D)


def transformer_forward(x_lnd, kernel_params_list, n_head):
    # TODO(synk): cross-layer weight prefetch (overlap next layer's weight DMA
    #             with the current layer's compute) not implemented.
    x = jnp.transpose(x_lnd, (1, 0, 2))      # (L, N, D) -> (N, L, D)
    for kp in kernel_params_list:
        x = resblock_apply(x, kp, n_head)
    return jnp.transpose(x, (1, 0, 2))       # back to (L, N, D)


# ----------------------------------------------------------------------------
# Parameters (shapes follow the PyTorch module; stored transposed for x @ W)
# ----------------------------------------------------------------------------
def init_block_params(key, D):
    ks = jax.random.split(key, 4)
    s = 0.02
    return {
        "ln1_g": jnp.ones((1, D), jnp.float32),
        "ln1_b": jnp.zeros((1, D), jnp.float32),
        "w_qkv": s * jax.random.normal(ks[0], (D, 3 * D), jnp.float32),
        "b_qkv": s * jax.random.normal(ks[1], (1, 3 * D), jnp.float32),
        "w_out": s * jax.random.normal(ks[2], (D, D), jnp.float32),
        "b_out": jnp.zeros((1, D), jnp.float32),
        "ln2_g": jnp.ones((1, D), jnp.float32),
        "ln2_b": jnp.zeros((1, D), jnp.float32),
        "w_fc": s * jax.random.normal(ks[3], (D, 4 * D), jnp.float32),
        "b_fc": jnp.zeros((1, 4 * D), jnp.float32),
        "w_proj": s * jax.random.normal(jax.random.fold_in(key, 7), (4 * D, D), jnp.float32),
        "b_proj": jnp.zeros((1, D), jnp.float32),
    }


def to_kernel_params(p, n_head):
    """bf16 weights for the MXU; fold the 1/sqrt(hd) query scale into W_qkv/b_qkv."""
    D = p["w_out"].shape[0]
    assert D % n_head == 0, "d_model must be divisible by n_head"
    hd = D // n_head
    scale = 1.0 / float(np.sqrt(hd))
    w_qkv = p["w_qkv"].at[:, :D].multiply(scale)
    b_qkv = p["b_qkv"].at[:, :D].multiply(scale)
    return {
        "ln1_g": p["ln1_g"], "ln1_b": p["ln1_b"],
        "w_qkv": w_qkv.astype(jnp.bfloat16), "b_qkv": b_qkv,
        "w_out": p["w_out"].astype(jnp.bfloat16), "b_out": p["b_out"],
        "ln2_g": p["ln2_g"], "ln2_b": p["ln2_b"],
        "w_fc": p["w_fc"].astype(jnp.bfloat16), "b_fc": p["b_fc"],
        "w_proj": p["w_proj"].astype(jnp.bfloat16), "b_proj": p["b_proj"],
    }


# ----------------------------------------------------------------------------
# Pure-JAX reference mirroring the kernel math (bf16 matmuls, f32 accumulation)
# ----------------------------------------------------------------------------
def _ln_ref(v, g, b):
    mu = jnp.mean(v, -1, keepdims=True)
    var = jnp.mean(jnp.square(v - mu), -1, keepdims=True)
    return (v - mu) * jax.lax.rsqrt(var + LN_EPS) * g + b


def ref_block(x_nld, kp, n_head):
    N, L, D = x_nld.shape
    hd = D // n_head
    x = x_nld.reshape(N * L, D)
    xn = _ln_ref(x, kp["ln1_g"], kp["ln1_b"])
    qkv = (jnp.dot(xn.astype(jnp.bfloat16), kp["w_qkv"],
                   preferred_element_type=jnp.float32) + kp["b_qkv"]).astype(jnp.bfloat16)

    def split_heads(t):
        return t.reshape(N, L, n_head, hd).transpose(0, 2, 1, 3)

    qh, kh, vh = (split_heads(qkv[:, :D]), split_heads(qkv[:, D:2 * D]),
                  split_heads(qkv[:, 2 * D:]))
    s = jnp.einsum("nhld,nhmd->nhlm", qh, kh, preferred_element_type=jnp.float32)
    s = s - jnp.max(s, -1, keepdims=True)
    p = jnp.exp(s)
    denom = jnp.sum(p, -1, keepdims=True)
    o = jnp.einsum("nhlm,nhmd->nhld", p.astype(jnp.bfloat16), vh,
                   preferred_element_type=jnp.float32)
    o = (o / denom).astype(jnp.bfloat16)
    a = o.transpose(0, 2, 1, 3).reshape(N * L, D)

    attn = jnp.dot(a, kp["w_out"], preferred_element_type=jnp.float32) + kp["b_out"]
    x = x + attn
    xn2 = _ln_ref(x, kp["ln2_g"], kp["ln2_b"])
    h1 = jnp.dot(xn2.astype(jnp.bfloat16), kp["w_fc"],
                 preferred_element_type=jnp.float32) + kp["b_fc"]
    h1 = h1 * jax.nn.sigmoid(1.702 * h1)
    mlp = jnp.dot(h1.astype(jnp.bfloat16), kp["w_proj"],
                  preferred_element_type=jnp.float32) + kp["b_proj"]
    return (x + mlp).reshape(N, L, D)


def ref_transformer(x_lnd, kernel_params_list, n_head):
    x = jnp.transpose(x_lnd, (1, 0, 2))
    for kp in kernel_params_list:
        x = ref_block(x, kp, n_head)
    return jnp.transpose(x, (1, 0, 2))


if __name__ == "__main__":
    L, N, D, HEADS, LAYERS = 8, 2, 32, 4, 2
    key = jax.random.PRNGKey(0)
    kx, kp = jax.random.split(key)
    x = jax.random.normal(kx, (L, N, D), jnp.float32)

    raw_params = [init_block_params(jax.random.fold_in(kp, i), D) for i in range(LAYERS)]
    kparams = [to_kernel_params(p, HEADS) for p in raw_params]

    fwd = jax.jit(transformer_forward, static_argnums=(2,))
    out = fwd(x, kparams, HEADS)
    out = jax.block_until_ready(out)

    ref = ref_transformer(x, kparams, HEADS)
    np.testing.assert_allclose(np.asarray(out), np.asarray(ref), rtol=2e-3, atol=2e-3)

    print("KERNEL_OK")
</pallas_src>

<mosaic_0001>
module attributes {stable_mosaic.version = 11 : i64} {
  func.func @ln_qkv_kernel(%arg0: i32, %arg1: memref<16x32xf32, #tpu.memory_space<vmem>>, %arg2: memref<1x32xf32, #tpu.memory_space<vmem>>, %arg3: memref<1x32xf32, #tpu.memory_space<vmem>>, %arg4: memref<32x96xbf16, #tpu.memory_space<vmem>>, %arg5: memref<1x96xf32, #tpu.memory_space<vmem>>, %arg6: memref<16x96xbf16, #tpu.memory_space<vmem>>) attributes {dimension_semantics = [#tpu.dimension_semantics<parallel>], iteration_bounds = array<i64: 1>, scalar_prefetch = 0 : i64, scratch_operands = 0 : i64, tpu.core_type = #tpu.core_type<tc>, window_params = [{transform_indices = @transform_0, window_bounds = array<i64: 16, 32>}, {pipeline_mode = #tpu.pipeline_mode<synchronous>, transform_indices = @transform_1, window_bounds = array<i64: 1, 32>}, {pipeline_mode = #tpu.pipeline_mode<synchronous>, transform_indices = @transform_2, window_bounds = array<i64: 1, 32>}, {pipeline_mode = #tpu.pipeline_mode<synchronous>, transform_indices = @transform_3, window_bounds = array<i64: 32, 96>}, {pipeline_mode = #tpu.pipeline_mode<synchronous>, transform_indices = @transform_4, window_bounds = array<i64: 1, 96>}, {transform_indices = @transform_5, window_bounds = array<i64: 16, 96>}]} {
    %c0 = arith.constant 0 : index
    %c0_0 = arith.constant 0 : index
    %0 = vector.load %arg1[%c0, %c0_0] : memref<16x32xf32, #tpu.memory_space<vmem>>, vector<16x32xf32>
    %c0_1 = arith.constant 0 : index
    %c0_2 = arith.constant 0 : index
    %1 = vector.load %arg2[%c0_1, %c0_2] : memref<1x32xf32, #tpu.memory_space<vmem>>, vector<1x32xf32>
    %c0_3 = arith.constant 0 : index
    %c0_4 = arith.constant 0 : index
    %2 = vector.load %arg3[%c0_3, %c0_4] : memref<1x32xf32, #tpu.memory_space<vmem>>, vector<1x32xf32>
    %cst = arith.constant dense<0.000000e+00> : vector<16xf32>
    %3 = vector.multi_reduction <add>, %0, %cst [1] : vector<16x32xf32> to vector<16xf32>
    %4 = vector.shape_cast %3 : vector<16xf32> to vector<16x1xf32>
    %cst_5 = arith.constant 3.200000e+01 : f32
    %5 = vector.broadcast %cst_5 : f32 to vector<16x1xf32>
    %6 = arith.divf %4, %5 : vector<16x1xf32>
    %7 = vector.broadcast %6 : vector<16x1xf32> to vector<16x32xf32>
    %8 = arith.subf %0, %7 : vector<16x32xf32>
    %9 = arith.mulf %8, %8 : vector<16x32xf32>
    %cst_6 = arith.constant dense<0.000000e+00> : vector<16xf32>
    %10 = vector.multi_reduction <add>, %9, %cst_6 [1] : vector<16x32xf32> to vector<16xf32>
    %11 = vector.shape_cast %10 : vector<16xf32> to vector<16x1xf32>
    %cst_7 = arith.constant 3.200000e+01 : f32
    %12 = vector.broadcast %cst_7 : f32 to vector<16x1xf32>
    %13 = arith.divf %11, %12 : vector<16x1xf32>
    %14 = vector.broadcast %6 : vector<16x1xf32> to vector<16x32xf32>
    %15 = arith.subf %0, %14 : vector<16x32xf32>
    %cst_8 = arith.constant 9.99999974E-6 : f32
    %16 = vector.broadcast %cst_8 : f32 to vector<16x1xf32>
    %17 = arith.addf %13, %16 : vector<16x1xf32>
    %18 = math.rsqrt %17 : vector<16x1xf32>
    %19 = vector.broadcast %18 : vector<16x1xf32> to vector<16x32xf32>
    %20 = arith.mulf %15, %19 : vector<16x32xf32>
    %21 = vector.broadcast %1 : vector<1x32xf32> to vector<16x32xf32>
    %22 = arith.mulf %20, %21 : vector<16x32xf32>
    %23 = vector.broadcast %2 : vector<1x32xf32> to vector<16x32xf32>
    %24 = arith.addf %22, %23 : vector<16x32xf32>
    %25 = arith.truncf %24 : vector<16x32xf32> to vector<16x32xbf16>
    %c0_9 = arith.constant 0 : index
    %c0_10 = arith.constant 0 : index
    %26 = vector.load %arg4[%c0_9, %c0_10] : memref<32x96xbf16, #tpu.memory_space<vmem>>, vector<32x96xbf16>
    %cst_11 = arith.constant dense<0.000000e+00> : vector<16x96xf32>
    %27 = tpu.matmul %25, %26, %cst_11 {dimension_numbers = #tpu.dot_dimension_numbers<[1], [0], [0], [1], [0, 0, 1, 1], [], []>} : vector<16x32xbf16>, vector<32x96xbf16>, vector<16x96xf32> -> vector<16x96xf32>
    %c0_12 = arith.constant 0 : index
    %c0_13 = arith.constant 0 : index
    %28 = vector.load %arg5[%c0_12, %c0_13] : memref<1x96xf32, #tpu.memory_space<vmem>>, vector<1x96xf32>
    %29 = vector.broadcast %28 : vector<1x96xf32> to vector<16x96xf32>
    %30 = arith.addf %27, %29 : vector<16x96xf32>
    %31 = arith.truncf %30 : vector<16x96xf32> to vector<16x96xbf16>
    %c0_14 = arith.constant 0 : index
    %c0_15 = arith.constant 0 : index
    %32 = vector.load %arg6[%c0_14, %c0_15] : memref<16x96xbf16, #tpu.memory_space<vmem>>, vector<16x96xbf16>
    tpu.vector_store %arg6[%c0_14, %c0_15], %31 {strides = array<i32>} : memref<16x96xbf16, #tpu.memory_space<vmem>>, vector<16x96xbf16>,
    return
  }
  func.func @transform_0(%arg0: i32) -> (i32, i32) {
    %c0_i32 = arith.constant 0 : i32
    %c0_i32_0 = arith.constant 0 : i32
    return %arg0, %c0_i32 : i32, i32
  }
  func.func @transform_1(%arg0: i32) -> (i32, i32) {
    %c0_i32 = arith.constant 0 : i32
    %c0_i32_0 = arith.constant 0 : i32
    %c0_i32_1 = arith.constant 0 : i32
    return %c0_i32, %c0_i32_0 : i32, i32
  }
  func.func @transform_2(%arg0: i32) -> (i32, i32) {
    %c0_i32 = arith.constant 0 : i32
    %c0_i32_0 = arith.constant 0 : i32
    %c0_i32_1 = arith.constant 0 : i32
    return %c0_i32, %c0_i32_0 : i32, i32
  }
  func.func @transform_3(%arg0: i32) -> (i32, i32) {
    %c0_i32 = arith.constant 0 : i32
    %c0_i32_0 = arith.constant 0 : i32
    %c0_i32_1 = arith.constant 0 : i32
    return %c0_i32, %c0_i32_0 : i32, i32
  }
  func.func @transform_4(%arg0: i32) -> (i32, i32) {
    %c0_i32 = arith.constant 0 : i32
    %c0_i32_0 = arith.constant 0 : i32
    %c0_i32_1 = arith.constant 0 : i32
    return %c0_i32, %c0_i32_0 : i32, i32
  }
  func.func @transform_5(%arg0: i32) -> (i32, i32) {
    %c0_i32 = arith.constant 0 : i32
    %c0_i32_0 = arith.constant 0 : i32
    return %arg0, %c0_i32 : i32, i32
  }
}

module attributes {stable_mosaic.version = 11 : i64} {
  func.func @attention_kernel(%arg0: i32, %arg1: memref<1x4x8x8xbf16, #tpu.memory_space<vmem>>, %arg2: memref<1x4x8x8xbf16, #tpu.memory_space<vmem>>, %arg3: memref<1x4x8x8xbf16, #tpu.memory_space<vmem>>, %arg4: memref<1x4x8x8xbf16, #tpu.memory_space<vmem>>) attributes {dimension_semantics = [#tpu.dimension_semantics<parallel>], iteration_bounds = array<i64: 2>, scalar_prefetch = 0 : i64, scratch_operands = 0 : i64, tpu.core_type = #tpu.core_type<tc>, window_params = [{transform_indices = @transform_0, window_bounds = array<i64: 1, 4, 8, 8>}, {transform_indices = @transform_1, window_bounds = array<i64: 1, 4, 8, 8>}, {transform_indices = @transform_2, window_bounds = array<i64: 1, 4, 8, 8>}, {transform_indices = @transform_3, window_bounds = array<i64: 1, 4, 8, 8>}]} {
    %c0 = arith.constant 0 : index
    %c0_0 = arith.constant 0 : index
    %c0_1 = arith.constant 0 : index
    %c0_2 = arith.constant 0 : index
    %0 = vector.load %arg1[%c0, %c0_0, %c0_1, %c0_2] : memref<1x4x8x8xbf16, #tpu.memory_space<vmem>>, vector<1x4x8x8xbf16>
    %1 = vector.shape_cast %0 : vector<1x4x8x8xbf16> to vector<4x8x8xbf16>
    %c0_3 = arith.constant 0 : index
    %c0_4 = arith.constant 0 : index
    %c0_5 = arith.constant 0 : index
    %c0_6 = arith.constant 0 : index
    %2 = vector.load %arg2[%c0_3, %c0_4, %c0_5, %c0_6] : memref<1x4x8x8xbf16, #tpu.memory_space<vmem>>, vector<1x4x8x8xbf16>
    %3 = vector.shape_cast %2 : vector<1x4x8x8xbf16> to vector<4x8x8xbf16>
    %c0_7 = arith.constant 0 : index
    %c0_8 = arith.constant 0 : index
    %c0_9 = arith.constant 0 : index
    %c0_10 = arith.constant 0 : index
    %4 = vector.load %arg3[%c0_7, %c0_8, %c0_9, %c0_10] : memref<1x4x8x8xbf16, #tpu.memory_space<vmem>>, vector<1x4x8x8xbf16>
    %5 = vector.shape_cast %4 : vector<1x4x8x8xbf16> to vector<4x8x8xbf16>
    "tpu.trace_start"() <{level = 10 : i32, message = "hld,hmd->hlm"}> : () -> ()
    %cst = arith.constant dense<0.000000e+00> : vector<4x8x8xf32>
    %6 = tpu.matmul %1, %3, %cst {dimension_numbers = #tpu.dot_dimension_numbers<[2], [2], [1], [1], [0, 0, 0, 1, 1, 1], [0], [0]>} : vector<4x8x8xbf16>, vector<4x8x8xbf16>, vector<4x8x8xf32> -> vector<4x8x8xf32>
    "tpu.trace_stop"() : () -> ()
    %cst_11 = arith.constant dense<0xFF800000> : vector<4x8xf32>
    %7 = vector.multi_reduction <maximumf>, %6, %cst_11 [2] : vector<4x8x8xf32> to vector<4x8xf32>
    %8 = vector.shape_cast %7 : vector<4x8xf32> to vector<4x8x1xf32>
    %9 = vector.broadcast %8 : vector<4x8x1xf32> to vector<4x8x8xf32>
    %10 = arith.subf %6, %9 : vector<4x8x8xf32>
    %11 = math.exp %10 : vector<4x8x8xf32>
    %cst_12 = arith.constant dense<0.000000e+00> : vector<4x8xf32>
    %12 = vector.multi_reduction <add>, %11, %cst_12 [2] : vector<4x8x8xf32> to vector<4x8xf32>
    %13 = vector.shape_cast %12 : vector<4x8xf32> to vector<4x8x1xf32>
    %14 = arith.truncf %11 : vector<4x8x8xf32> to vector<4x8x8xbf16>
    "tpu.trace_start"() <{level = 10 : i32, message = "hlm,hmd->hld"}> : () -> ()
    %cst_13 = arith.constant dense<0.000000e+00> : vector<4x8x8xf32>
    %15 = tpu.matmul %14, %5, %cst_13 {dimension_numbers = #tpu.dot_dimension_numbers<[2], [1], [1], [2], [0, 0, 0, 1, 1, 2], [0], [0]>} : vector<4x8x8xbf16>, vector<4x8x8xbf16>, vector<4x8x8xf32> -> vector<4x8x8xf32>
    "tpu.trace_stop"() : () -> ()
    %16 = vector.broadcast %13 : vector<4x8x1xf32> to vector<4x8x8xf32>
    %17 = arith.divf %15, %16 : vector<4x8x8xf32>
    %18 = arith.truncf %17 : vector<4x8x8xf32> to vector<4x8x8xbf16>
    %c0_14 = arith.constant 0 : index
    %c0_15 = arith.constant 0 : index
    %c0_16 = arith.constant 0 : index
    %c0_17 = arith.constant 0 : index
    %19 = vector.load %arg4[%c0_14, %c0_15, %c0_16, %c0_17] : memref<1x4x8x8xbf16, #tpu.memory_space<vmem>>, vector<1x4x8x8xbf16>
    %20 = vector.shape_cast %19 : vector<1x4x8x8xbf16> to vector<4x8x8xbf16>
    %21 = vector.shape_cast %18 : vector<4x8x8xbf16> to vector<1x4x8x8xbf16>
    tpu.vector_store %arg4[%c0_14, %c0_15, %c0_16, %c0_17], %21 {strides = array<i32>} : memref<1x4x8x8xbf16, #tpu.memory_space<vmem>>, vector<1x4x8x8xbf16>,
    return
  }
  func.func @transform_0(%arg0: i32) -> (i32, i32, i32, i32) {
    %c0_i32 = arith.constant 0 : i32
    %c0_i32_0 = arith.constant 0 : i32
    %c0_i32_1 = arith.constant 0 : i32
    %c0_i32_2 = arith.constant 0 : i32
    return %arg0, %c0_i32, %c0_i32_0, %c0_i32_1 : i32, i32, i32, i32
  }
  func.func @transform_1(%arg0: i32) -> (i32, i32, i32, i32) {
    %c0_i32 = arith.constant 0 : i32
    %c0_i32_0 = arith.constant 0 : i32
    %c0_i32_1 = arith.constant 0 : i32
    %c0_i32_2 = arith.constant 0 : i32
    return %arg0, %c0_i32, %c0_i32_0, %c0_i32_1 : i32, i32, i32, i32
  }
  func.func @transform_2(%arg0: i32) -> (i32, i32, i32, i32) {
    %c0_i32 = arith.constant 0 : i32
    %c0_i32_0 = arith.constant 0 : i32
    %c0_i32_1 = arith.constant 0 : i32
    %c0_i32_2 = arith.constant 0 : i32
    return %arg0, %c0_i32, %c0_i32_0, %c0_i32_1 : i32, i32, i32, i32
  }
  func.func @transform_3(%arg0: i32) -> (i32, i32, i32, i32) {
    %c0_i32 = arith.constant 0 : i32
    %c0_i32_0 = arith.constant 0 : i32
    %c0_i32_1 = arith.constant 0 : i32
    %c0_i32_2 = arith.constant 0 : i32
    return %arg0, %c0_i32, %c0_i32_0, %c0_i32_1 : i32, i32, i32, i32
  }
}

module attributes {stable_mosaic.version = 11 : i64} {
  func.func @proj_mlp_kernel(%arg0: i32, %arg1: memref<16x32xf32, #tpu.memory_space<vmem>>, %arg2: memref<16x32xbf16, #tpu.memory_space<vmem>>, %arg3: memref<32x32xbf16, #tpu.memory_space<vmem>>, %arg4: memref<1x32xf32, #tpu.memory_space<vmem>>, %arg5: memref<1x32xf32, #tpu.memory_space<vmem>>, %arg6: memref<1x32xf32, #tpu.memory_space<vmem>>, %arg7: memref<32x128xbf16, #tpu.memory_space<vmem>>, %arg8: memref<1x128xf32, #tpu.memory_space<vmem>>, %arg9: memref<128x32xbf16, #tpu.memory_space<vmem>>, %arg10: memref<1x32xf32, #tpu.memory_space<vmem>>, %arg11: memref<16x32xf32, #tpu.memory_space<vmem>>) attributes {dimension_semantics = [#tpu.dimension_semantics<parallel>], iteration_bounds = array<i64: 1>, scalar_prefetch = 0 : i64, scratch_operands = 0 : i64, tpu.core_type = #tpu.core_type<tc>, window_params = [{transform_indices = @transform_0, window_bounds = array<i64: 16, 32>}, {transform_indices = @transform_1, window_bounds = array<i64: 16, 32>}, {pipeline_mode = #tpu.pipeline_mode<synchronous>, transform_indices = @transform_2, window_bounds = array<i64: 32, 32>}, {pipeline_mode = #tpu.pipeline_mode<synchronous>, transform_indices = @transform_3, window_bounds = array<i64: 1, 32>}, {pipeline_mode = #tpu.pipeline_mode<synchronous>, transform_indices = @transform_4, window_bounds = array<i64: 1, 32>}, {pipeline_mode = #tpu.pipeline_mode<synchronous>, transform_indices = @transform_5, window_bounds = array<i64: 1, 32>}, {pipeline_mode = #tpu.pipeline_mode<synchronous>, transform_indices = @transform_6, window_bounds = array<i64: 32, 128>}, {pipeline_mode = #tpu.pipeline_mode<synchronous>, transform_indices = @transform_7, window_bounds = array<i64: 1, 128>}, {pipeline_mode = #tpu.pipeline_mode<synchronous>, transform_indices = @transform_8, window_bounds = array<i64: 128, 32>}, {pipeline_mode = #tpu.pipeline_mode<synchronous>, transform_indices = @transform_9, window_bounds = array<i64: 1, 32>}, {transform_indices = @transform_10, window_bounds = array<i64: 16, 32>}]} {
    %c0 = arith.constant 0 : index
    %c0_0 = arith.constant 0 : index
    %0 = vector.load %arg1[%c0, %c0_0] : memref<16x32xf32, #tpu.memory_space<vmem>>, vector<16x32xf32>
    %c0_1 = arith.constant 0 : index
    %c0_2 = arith.constant 0 : index
    %1 = vector.load %arg2[%c0_1, %c0_2] : memref<16x32xbf16, #tpu.memory_space<vmem>>, vector<16x32xbf16>
    %c0_3 = arith.constant 0 : index
    %c0_4 = arith.constant 0 : index
    %2 = vector.load %arg3[%c0_3, %c0_4] : memref<32x32xbf16, #tpu.memory_space<vmem>>, vector<32x32xbf16>
    %cst = arith.constant dense<0.000000e+00> : vector<16x32xf32>
    %3 = tpu.matmul %1, %2, %cst {dimension_numbers = #tpu.dot_dimension_numbers<[1], [0], [0], [1], [0, 0, 1, 1], [], []>} : vector<16x32xbf16>, vector<32x32xbf16>, vector<16x32xf32> -> vector<16x32xf32>
    %c0_5 = arith.constant 0 : index
    %c0_6 = arith.constant 0 : index
    %4 = vector.load %arg4[%c0_5, %c0_6] : memref<1x32xf32, #tpu.memory_space<vmem>>, vector<1x32xf32>
    %5 = vector.broadcast %4 : vector<1x32xf32> to vector<16x32xf32>
    %6 = arith.addf %3, %5 : vector<16x32xf32>
    %7 = arith.addf %0, %6 : vector<16x32xf32>
    %c0_7 = arith.constant 0 : index
    %c0_8 = arith.constant 0 : index
    %8 = vector.load %arg5[%c0_7, %c0_8] : memref<1x32xf32, #tpu.memory_space<vmem>>, vector<1x32xf32>
    %c0_9 = arith.constant 0 : index
    %c0_10 = arith.constant 0 : index
    %9 = vector.load %arg6[%c0_9, %c0_10] : memref<1x32xf32, #tpu.memory_space<vmem>>, vector<1x32xf32>
    %cst_11 = arith.constant dense<0.000000e+00> : vector<16xf32>
    %10 = vector.multi_reduction <add>, %7, %cst_11 [1] : vector<16x32xf32> to vector<16xf32>
    %11 = vector.shape_cast %10 : vector<16xf32> to vector<16x1xf32>
    %cst_12 = arith.constant 3.200000e+01 : f32
    %12 = vector.broadcast %cst_12 : f32 to vector<16x1xf32>
    %13 = arith.divf %11, %12 : vector<16x1xf32>
    %14 = vector.broadcast %13 : vector<16x1xf32> to vector<16x32xf32>
    %15 = arith.subf %7, %14 : vector<16x32xf32>
    %16 = arith.mulf %15, %15 : vector<16x32xf32>
    %cst_13 = arith.constant dense<0.000000e+00> : vector<16xf32>
    %17 = vector.multi_reduction <add>, %16, %cst_13 [1] : vector<16x32xf32> to vector<16xf32>
    %18 = vector.shape_cast %17 : vector<16xf32> to vector<16x1xf32>
    %cst_14 = arith.constant 3.200000e+01 : f32
    %19 = vector.broadcast %cst_14 : f32 to vector<16x1xf32>
    %20 = arith.divf %18, %19 : vector<16x1xf32>
    %21 = vector.broadcast %13 : vector<16x1xf32> to vector<16x32xf32>
    %22 = arith.subf %7, %21 : vector<16x32xf32>
    %cst_15 = arith.constant 9.99999974E-6 : f32
    %23 = vector.broadcast %cst_15 : f32 to vector<16x1xf32>
    %24 = arith.addf %20, %23 : vector<16x1xf32>
    %25 = math.rsqrt %24 : vector<16x1xf32>
    %26 = vector.broadcast %25 : vector<16x1xf32> to vector<16x32xf32>
    %27 = arith.mulf %22, %26 : vector<16x32xf32>
    %28 = vector.broadcast %8 : vector<1x32xf32> to vector<16x32xf32>
    %29 = arith.mulf %27, %28 : vector<16x32xf32>
    %30 = vector.broadcast %9 : vector<1x32xf32> to vector<16x32xf32>
    %31 = arith.addf %29, %30 : vector<16x32xf32>
    %32 = arith.truncf %31 : vector<16x32xf32> to vector<16x32xbf16>
    %c0_16 = arith.constant 0 : index
    %c0_17 = arith.constant 0 : index
    %33 = vector.load %arg7[%c0_16, %c0_17] : memref<32x128xbf16, #tpu.memory_space<vmem>>, vector<32x128xbf16>
    %cst_18 = arith.constant dense<0.000000e+00> : vector<16x128xf32>
    %34 = tpu.matmul %32, %33, %cst_18 {dimension_numbers = #tpu.dot_dimension_numbers<[1], [0], [0], [1], [0, 0, 1, 1], [], []>} : vector<16x32xbf16>, vector<32x128xbf16>, vector<16x128xf32> -> vector<16x128xf32>
    %c0_19 = arith.constant 0 : index
    %c0_20 = arith.constant 0 : index
    %35 = vector.load %arg8[%c0_19, %c0_20] : memref<1x128xf32, #tpu.memory_space<vmem>>, vector<1x128xf32>
    %36 = vector.broadcast %35 : vector<1x128xf32> to vector<16x128xf32>
    %37 = arith.addf %34, %36 : vector<16x128xf32>
    %cst_21 = arith.constant 1.702000e+00 : f32
    %38 = vector.broadcast %cst_21 : f32 to vector<16x128xf32>
    %39 = arith.mulf %38, %37 : vector<16x128xf32>
    %40 = arith.negf %39 : vector<16x128xf32>
    %41 = math.exp %40 : vector<16x128xf32>
    %cst_22 = arith.constant 1.000000e+00 : f32
    %42 = vector.broadcast %cst_22 : f32 to vector<16x128xf32>
    %43 = arith.addf %42, %41 : vector<16x128xf32>
    %44 = arith.divf %42, %43 : vector<16x128xf32>
    %45 = arith.mulf %37, %44 : vector<16x128xf32>
    %46 = arith.truncf %45 : vector<16x128xf32> to vector<16x128xbf16>
    %c0_23 = arith.constant 0 : index
    %c0_24 = arith.constant 0 : index
    %47 = vector.load %arg9[%c0_23, %c0_24] : memref<128x32xbf16, #tpu.memory_space<vmem>>, vector<128x32xbf16>
    %cst_25 = arith.constant dense<0.000000e+00> : vector<16x32xf32>
    %48 = tpu.matmul %46, %47, %cst_25 {dimension_numbers = #tpu.dot_dimension_numbers<[1], [0], [0], [1], [0, 0, 1, 1], [], []>} : vector<16x128xbf16>, vector<128x32xbf16>, vector<16x32xf32> -> vector<16x32xf32>
    %c0_26 = arith.constant 0 : index
    %c0_27 = arith.constant 0 : index
    %49 = vector.load %arg10[%c0_26, %c0_27] : memref<1x32xf32, #tpu.memory_space<vmem>>, vector<1x32xf32>
    %50 = vector.broadcast %49 : vector<1x32xf32> to vector<16x32xf32>
    %51 = arith.addf %48, %50 : vector<16x32xf32>
    %52 = arith.addf %7, %51 : vector<16x32xf32>
    %c0_28 = arith.constant 0 : index
    %c0_29 = arith.constant 0 : index
    %53 = vector.load %arg11[%c0_28, %c0_29] : memref<16x32xf32, #tpu.memory_space<vmem>>, vector<16x32xf32>
    tpu.vector_store %arg11[%c0_28, %c0_29], %52 {strides = array<i32>} : memref<16x32xf32, #tpu.memory_space<vmem>>, vector<16x32xf32>,
    return
  }
  func.func @transform_0(%arg0: i32) -> (i32, i32) {
    %c0_i32 = arith.constant 0 : i32
    %c0_i32_0 = arith.constant 0 : i32
    return %arg0, %c0_i32 : i32, i32
  }
  func.func @transform_1(%arg0: i32) -> (i32, i32) {
    %c0_i32 = arith.constant 0 : i32
    %c0_i32_0 = arith.constant 0 : i32
    return %arg0, %c0_i32 : i32, i32
  }
  func.func @transform_2(%arg0: i32) -> (i32, i32) {
    %c0_i32 = arith.constant 0 : i32
    %c0_i32_0 = arith.constant 0 : i32
    %c0_i32_1 = arith.constant 0 : i32
    return %c0_i32, %c0_i32_0 : i32, i32
  }
  func.func @transform_3(%arg0: i32) -> (i32, i32) {
    %c0_i32 = arith.constant 0 : i32
    %c0_i32_0 = arith.constant 0 : i32
    %c0_i32_1 = arith.constant 0 : i32
    return %c0_i32, %c0_i32_0 : i32, i32
  }
  func.func @transform_4(%arg0: i32) -> (i32, i32) {
    %c0_i32 = arith.constant 0 : i32
    %c0_i32_0 = arith.constant 0 : i32
    %c0_i32_1 = arith.constant 0 : i32
    return %c0_i32, %c0_i32_0 : i32, i32
  }
  func.func @transform_5(%arg0: i32) -> (i32, i32) {
    %c0_i32 = arith.constant 0 : i32
    %c0_i32_0 = arith.constant 0 : i32
    %c0_i32_1 = arith.constant 0 : i32
    return %c0_i32, %c0_i32_0 : i32, i32
  }
  func.func @transform_6(%arg0: i32) -> (i32, i32) {
    %c0_i32 = arith.constant 0 : i32
    %c0_i32_0 = arith.constant 0 : i32
    %c0_i32_1 = arith.constant 0 : i32
    return %c0_i32, %c0_i32_0 : i32, i32
  }
  func.func @transform_7(%arg0: i32) -> (i32, i32) {
    %c0_i32 = arith.constant 0 : i32
    %c0_i32_0 = arith.constant 0 : i32
    %c0_i32_1 = arith.constant 0 : i32
    return %c0_i32, %c0_i32_0 : i32, i32
  }
  func.func @transform_8(%arg0: i32) -> (i32, i32) {
    %c0_i32 = arith.constant 0 : i32
    %c0_i32_0 = arith.constant 0 : i32
    %c0_i32_1 = arith.constant 0 : i32
    return %c0_i32, %c0_i32_0 : i32, i32
  }
  func.func @transform_9(%arg0: i32) -> (i32, i32) {
    %c0_i32 = arith.constant 0 : i32
    %c0_i32_0 = arith.constant 0 : i32
    %c0_i32_1 = arith.constant 0 : i32
    return %c0_i32, %c0_i32_0 : i32, i32
  }
  func.func @transform_10(%arg0: i32) -> (i32, i32) {
    %c0_i32 = arith.constant 0 : i32
    %c0_i32_0 = arith.constant 0 : i32
    return %arg0, %c0_i32 : i32, i32
  }
}

</mosaic_0001>

<bundles_post_ra>
// kernel: transformer_forward.6
= control target key start
LH: loop header
LB: loop body
LE: loop exit
PB: predicated region body
PF: predicated region fallthrough
CT: control target
= control target key end

     0   :  { %vm25_vm0 = vcmask 261120   ;;  %v181_v15 = vmov 0.0   ;;  %vm182_vm1 = vmmov 0   ;;  %vm145_vm2 = vcmask 781312   ;;  %s245_s0 = inlined_call_operand.vmem [shape: f32[16,32], index: 0, kind: input, shape index: {}]   ;;  %s246_s3 = inlined_call_operand.vmem [shape: bf16[32,96], index: 3, kind: input, shape index: {}]   ;;  %s247_s1 = inlined_call_operand.vmem [shape: f32[1,32], index: 1, kind: input, shape index: {}]   ;;  %s248_s2 = inlined_call_operand.vmem [shape: f32[1,32], index: 2, kind: input, shape index: {}]   ;;  %s249_s4 = inlined_call_operand.vmem [shape: f32[1,96], index: 4, kind: input, shape index: {}]   ;;  %s250_s5 = inlined_call_operand.vmem [shape: bf16[16,96], index: 5, kind: output, shape index: {}]  }
   0x1   :  { %v21_v0 = vld [vmem:[%s245_s0] sm:$0xff]  ;;  %v22_v1 = vld [vmem:[%s245_s0 + $0x8] sm:$0xff]  ;;  %165 = vmatprep.subr.bf16.mxu0 %v181_v15  ;;  %169 = vmatprep.mubr.msk.bf16.mxu0 %vm182_vm1, %v181_v15 }
   0x2   :  { %v26_v2 = vsel %vm25_vm0, %v21_v0, 0.0  ;;  %v29_v3 = vsel %vm25_vm0, %v22_v1, 0.0  ;;  %v175_v14 = vld [vmem:[%s246_s3] sm:$0xff]   ;;  %v176_v16 = vld [vmem:[%s246_s3 + $0x8] sm:$0xff]  }
   0x3   :  { %27 = vadd.xlane.f32.xlu0 %v26_v2  ;;  %166 = vmatpush3.bf16.msra.mxu0 %v175_v14  ;;  %v152_v25 = vld [vmem:[%s247_s1] ss:$0 sm:$0xff] }
   0x4   :  { %167 = vmatprep.subr.bf16.mxu0 %v181_v15  ;;  %v153_v29 = vld [vmem:[%s248_s2] ss:$0 sm:$0xff] }
   0x5   :  { %v154_v34 = vld [vmem:[%s249_s4] ss:$0 sm:$0xff] }
   0x7   :  { %30 = vadd.xlane.f32.xlu0 %v29_v3  ;;  %168 = vmatpush3.bf16.msra.mxu0 %v176_v16 }
  0x90   :  { %v28_v4 = vpop.xlane.xlu0 %27 }
  0x91   :  { %v33_v5 = vmul.f32 0.03125, %v28_v4 }
  0x93   :  { %v35_v6 = vsub.f32 %v21_v0, %v33_v5 }
  0x94   :  { %v31_v7 = vpop.xlane.xlu0 %30 }
  0x95   :  { %v34_v8 = vmul.f32 0.03125, %v31_v7  ;;  %v37_v9 = vmul.f32 %v35_v6, %v35_v6 }
  0x97   :  { %v36_v10 = vsub.f32 %v22_v1, %v34_v8  ;;  %v39_v11 = vsel %vm25_vm0, %v37_v9, 0.0 }
  0x98   :  { %40 = vadd.xlane.f32.xlu1 %v39_v11 }
  0x99   :  { %v38_v12 = vmul.f32 %v36_v10, %v36_v10 }
  0x9b   :  { %v42_v13 = vsel %vm25_vm0, %v38_v12, 0.0 }
  0x9c   :  { %43 = vadd.xlane.f32.xlu1 %v42_v13 }
 0x125   :  { %v41_v17 = vpop.xlane.xlu1 %40 }
 0x126   :  { %v45_v18 = vmul.f32 0.03125, %v41_v17 }
 0x128   :  { %v47_v19 = vadd.f32 1e-05, %v45_v18 }
 0x129   :  { %v44_v20 = vpop.xlane.xlu1 %43 }
 0x12a   :  { %177 = vrsqrt.f32 %v47_v19  ;;  %v46_v21 = vmul.f32 0.03125, %v44_v20 }
 0x12c   :  { %v48_v22 = vadd.f32 1e-05, %v46_v21 }
 0x12e   :  { %179 = vrsqrt.f32 %v48_v22 }
 0x134   :  { %v178_v23 = vpop.eup %177 }
 0x135   :  { %v51_v24 = vmul.f32 %v178_v23, %v35_v6 }
 0x137   :  { %v59_v28 = vmul.f32 %v152_v25, %v51_v24 }
 0x138   :  { %v180_v26 = vpop.eup %179 }
 0x139   :  { %v52_v27 = vmul.f32 %v180_v26, %v36_v10  ;;  %v67_v31 = vadd.f32 %v153_v29, %v59_v28 }
 0x13b   :  { %v60_v30 = vmul.f32 %v152_v25, %v52_v27 }
 0x13d   :  { %v68_v32 = vadd.f32 %v153_v29, %v60_v30 }
 0x13f   :  { %v69_v33 = vpack.c.bf16 %v68_v32, %v67_v31 }
 0x141   :  { %170 = vmatmul.mubr.msk.bf16.vlgmr.msra.gmra.mrb[0].mxu0 %vm25_vm0, %v69_v33 }
 0x214   :  { %v130_v35 = vpop.f32.mrb[0].mxu0 }
 0x215   :  { %v131_v36 = vadd.f32 %v154_v34, %v130_v35  ;;  %v171_v37 = vpop.f32.mrb[1].mxu0 }
 0x216   :  { %v133_v38 = vpop.f32.mrb[2].mxu0 }
 0x217   :  { %v160_v39 = vpack.c.bf16 %v131_v36, %v131_v36  ;;  %v134_v40 = vadd.f32 %v154_v34, %v133_v38  ;;  %v172_v41 = vpop.f32.mrb[3].mxu0 }
 0x219   :  { %146 = vst.msk [vmem:[%s250_s5] sm:$0xf] %vm145_vm2, %v160_v39  ;;  %v161_v42 = vpack.c.bf16 %v134_v40, %v134_v40 }
 0x21b   :  { %147 = vst.msk [vmem:[%s250_s5 + $0x4] sm:$0xf] %vm145_vm2, %v161_v42 }

// kernel: transformer_forward.7
= control target key start
LH: loop header
LB: loop body
LE: loop exit
PB: predicated region body
PF: predicated region fallthrough
CT: control target
= control target key end

     0   :  { %s877_s12 = smov 0   ;;  %s954_s0 = inlined_call_operand.vmem [shape: bf16[2,4,8,8], index: 0, kind: input, shape index: {}]   ;;  %s955_s1 = inlined_call_operand.vmem [shape: bf16[2,4,8,8], index: 1, kind: input, shape index: {}]   ;;  %s956_s2 = inlined_call_operand.vmem [shape: bf16[2,4,8,8], index: 2, kind: input, shape index: {}]   ;;  %s957_s3 = inlined_call_operand.vmem [shape: bf16[2,4,8,8], index: 3, kind: output, shape index: {}]  }
   0x1 LB: > { %s730_s13 = sadd.s32 4294967295, %s853_s12   ;;  %p734_p0 = scmp.ge.s32.totalorder %s853_s12, 1  ;;  %s853_s12 = sphi %s877_s12, %s13_s12  }
   0x2   : > { %p157_p1 = scmp.lt.s32.totalorder %s853_s12, 3 }
   0x4   : > { %p158_p2 = pnand %p734_p0, %p157_p1 }
   0x5   : > { %p191_p3 = scmp.lt.s32.totalorder (!%p158_p2), %s730_s13, 1  ;;  %v855_v0 = vmov (!%p158_p2), 0.0   ;;  %vm856_vm0 = vmmov (!%p158_p2), 0   ;;  %vm224_vm1 = vcmask (!%p158_p2), 64512   ;;  %vm452_vm2 = vcmask (!%p158_p2), 1043456  }
   0x6   : > { %161 = sbr.rel (%p158_p2) target bundleno = 626 (0x272), region = 32  ;;  %773 = vmatprep.subr.bf16.mxu0 (!%p158_p2), %v855_v0  ;;  %779 = vmatprep.subr.bf16.mxu1 (!%p158_p2), %v855_v0  ;;  %vm646_vm3 = vcmask (!%p158_p2), 60416  }
   0x7   : > { %775 = vmatprep.mubr.msk.bf16.mxu0 (!%p158_p2), %vm856_vm0, %v855_v0  ;;  %781 = vmatprep.mubr.msk.bf16.mxu1 (!%p158_p2), %vm856_vm0, %v855_v0 }
   0xd   : > { %s959_s13 = smov (!%p191_p3, %s730_s13), 1 }
   0xe   : > { %s891_s14 = sshll.u32 %s959_s13, 4 }
   0xf   : > { %s200_s17 = scalar_lea.vmem %s955_s1, %s891_s14  ;;  %s195_s20 = scalar_lea.vmem %s954_s0, %s891_s14 }
  0x10   : > { %v216_v1 = vld [vmem:[%s200_s17] sm:$0xf]  ;;  %v217_v2 = vld [vmem:[%s200_s17 + $0x4] sm:$0xf]  ;;  %v218_v5 = vld [vmem:[%s200_s17 + $0x8] sm:$0xf]  ;;  %s205_s23 = scalar_lea.vmem %s956_s2, %s891_s14  ;;  %s210_s26 = scalar_lea.vmem %s957_s3, %s891_s14 }
  0x11   : > { %v229_v3 = vsel %vm224_vm1, %v216_v1, 0  ;;  %v275_v4 = vsel %vm224_vm1, %v217_v2, 0  ;;  %v219_v6 = vld [vmem:[%s200_s17 + $0xc] sm:$0xf]  ;;  %v212_v7 = vld [vmem:[%s195_s20] sm:$0xf] }
  0x12   : > { %774 = vmatpush3.bf16.xpose.msra.mxu0 %v229_v3  ;;  %780 = vmatpush3.bf16.xpose.msra.mxu1 %v275_v4  ;;  %v213_v8 = vld [vmem:[%s195_s20 + $0x4] sm:$0xf]  ;;  %v321_v9 = vsel %vm224_vm1, %v218_v5, 0  ;;  %v367_v10 = vsel %vm224_vm1, %v219_v6, 0  ;;  %v214_v11 = vld [vmem:[%s195_s20 + $0x8] sm:$0xf] }
  0x13   : > { %785 = vmatprep.subr.bf16.mxu0 %v855_v0  ;;  %791 = vmatprep.subr.bf16.mxu1 %v855_v0  ;;  %v215_v12 = vld [vmem:[%s195_s20 + $0xc] sm:$0xf]  ;;  %v220_v33 = vld [vmem:[%s205_s23] sm:$0xf]  ;;  %v221_v35 = vld [vmem:[%s205_s23 + $0x4] sm:$0xf] }
  0x14   : > { %v454_v34 = vsel %vm452_vm2, %v220_v33, 0  ;;  %v500_v36 = vsel %vm452_vm2, %v221_v35, 0  ;;  %v222_v37 = vld [vmem:[%s205_s23 + $0x8] sm:$0xf]  ;;  %v223_v39 = vld [vmem:[%s205_s23 + $0xc] sm:$0xf] }
  0x15   : > { %v546_v38 = vsel %vm452_vm2, %v222_v37, 0  ;;  %v592_v40 = vsel %vm452_vm2, %v223_v39, 0 }
  0x19   : > { %776 = vmatmul.mubr.msk.bf16.vlgmr.msra.gmra.mrb[0].mxu0 %vm224_vm1, %v212_v7  ;;  %782 = vmatmul.mubr.msk.bf16.vlgmr.msra.gmra.mrb[0].mxu1 %vm224_vm1, %v213_v8 }
  0x1a   : > { %786 = vmatpush3.bf16.xpose.msra.mxu0 %v321_v9  ;;  %792 = vmatpush3.bf16.xpose.msra.mxu1 %v367_v10 }
  0x1b   : > { %787 = vmatprep.mubr.msk.bf16.mxu0 %vm856_vm0, %v855_v0  ;;  %793 = vmatprep.mubr.msk.bf16.mxu1 %vm856_vm0, %v855_v0 }
  0x1c   : > { %797 = vmatprep.subr.bf16.mxu0 %v855_v0  ;;  %803 = vmatprep.subr.bf16.mxu1 %v855_v0 }
  0x21   : > { %788 = vmatmul.mubr.msk.bf16.vlgmr.msra.gmra.mrb[4].mxu0 %vm224_vm1, %v214_v11  ;;  %794 = vmatmul.mubr.msk.bf16.vlgmr.msra.gmra.mrb[4].mxu1 %vm224_vm1, %v215_v12 }
  0x22   : > { %799 = vmatprep.mubr.msk.bf16.mxu0 %vm856_vm0, %v855_v0  ;;  %805 = vmatprep.mubr.msk.bf16.mxu1 %vm856_vm0, %v855_v0 }
  0x23   : > { %798 = vmatpush3.bf16.msra.mxu0 %v454_v34  ;;  %804 = vmatpush3.bf16.msra.mxu1 %v500_v36 }
  0x24   : > { %809 = vmatprep.subr.bf16.mxu0 %v855_v0  ;;  %815 = vmatprep.subr.bf16.mxu1 %v855_v0 }
  0xec   : > { %v265_v13 = vpop.f32.mrb[0].mxu0  ;;  %v311_v14 = vpop.f32.mrb[0].mxu1 }
  0xed   : > { %v777_v15 = vpop.f32.mrb[1].mxu0  ;;  %v409_v16 = vsel %vm224_vm1, %v265_v13, -inf  ;;  %v783_v17 = vpop.f32.mrb[1].mxu1  ;;  %v412_v22 = vsel %vm224_vm1, %v311_v14, -inf }
  0xee   : > { %410 = vmax.xlane.f32.xlu0 %v409_v16  ;;  %v268_v18 = vpop.f32.mrb[2].mxu0  ;;  %v314_v19 = vpop.f32.mrb[2].mxu1 }
  0xef   : > { %v778_v20 = vpop.f32.mrb[3].mxu0  ;;  %v784_v21 = vpop.f32.mrb[3].mxu1 }
  0xf2   : > { %413 = vmax.xlane.f32.xlu0 %v412_v22 }
  0xf4   : > { %v357_v23 = vpop.f32.mrb[4].mxu0  ;;  %v403_v24 = vpop.f32.mrb[4].mxu1 }
  0xf5   : > { %v789_v25 = vpop.f32.mrb[5].mxu0  ;;  %v415_v26 = vsel %vm224_vm1, %v357_v23, -inf  ;;  %v795_v27 = vpop.f32.mrb[5].mxu1  ;;  %v418_v32 = vsel %vm224_vm1, %v403_v24, -inf }
  0xf6   : > { %416 = vmax.xlane.f32.xlu1 %v415_v26  ;;  %v360_v28 = vpop.f32.mrb[6].mxu0  ;;  %v406_v29 = vpop.f32.mrb[6].mxu1 }
  0xf7   : > { %v790_v30 = vpop.f32.mrb[7].mxu0  ;;  %v796_v31 = vpop.f32.mrb[7].mxu1 }
  0xfa   : > { %419 = vmax.xlane.f32.xlu1 %v418_v32 }
 0x17b   : > { %v411_v41 = vpop.xlane.xlu0 %410 }
 0x17c   : > { %v421_v42 = vsub.f32 %v265_v13, %v411_v41 }
 0x17e   : > { %v425_v43 = vmul.f32 1.442695, %v421_v42 }
 0x17f   : > { %v414_v44 = vpop.xlane.xlu0 %413 }
 0x180   : > { %831 = vpow2.f32 %v425_v43  ;;  %v422_v45 = vsub.f32 %v311_v14, %v414_v44 }
 0x182   : > { %v427_v46 = vmul.f32 1.442695, %v422_v45 }
 0x183   : > { %v417_v47 = vpop.xlane.xlu1 %416 }
 0x184   : > { %833 = vpow2.f32 %v427_v46  ;;  %v423_v48 = vsub.f32 %v357_v23, %v417_v47 }
 0x186   : > { %v429_v49 = vmul.f32 1.442695, %v423_v48 }
 0x187   : > { %v420_v50 = vpop.xlane.xlu1 %419 }
 0x188   : > { %835 = vpow2.f32 %v429_v49  ;;  %v424_v51 = vsub.f32 %v403_v24, %v420_v50 }
 0x18a   : > { %v832_v52 = vpop.eup %831  ;;  %v431_v53 = vmul.f32 1.442695, %v424_v51 }
 0x18b   : > { %v433_v54 = vsel %vm224_vm1, %v832_v52, 0.0  ;;  %v445_v55 = vpack.c.bf16 %v832_v52, %v832_v52 }
 0x18c   : > { %837 = vpow2.f32 %v431_v53  ;;  %434 = vadd.xlane.f32.xlu0 %v433_v54 }
 0x18d   : > { %800 = vmatmul.mubr.msk.bf16.vlgmr.msra.gmra.mrb[8].mxu0 %vm224_vm1, %v445_v55 }
 0x18e   : > { %v834_v56 = vpop.eup %833  ;;  %810 = vmatpush3.bf16.msra.mxu0 %v546_v38  ;;  %811 = vmatprep.mubr.msk.bf16.mxu0 %vm856_vm0, %v855_v0 }
 0x18f   : > { %v436_v57 = vsel %vm224_vm1, %v834_v56, 0.0  ;;  %v446_v58 = vpack.c.bf16 %v834_v56, %v834_v56 }
 0x190   : > { %437 = vadd.xlane.f32.xlu1 %v436_v57 }
 0x191   : > { %806 = vmatmul.mubr.msk.bf16.vlgmr.msra.gmra.mrb[8].mxu1 %vm224_vm1, %v446_v58 }
 0x192   : > { %v836_v59 = vpop.eup %835  ;;  %816 = vmatpush3.bf16.msra.mxu1 %v592_v40  ;;  %817 = vmatprep.mubr.msk.bf16.mxu1 %vm856_vm0, %v855_v0 }
 0x193   : > { %v439_v60 = vsel %vm224_vm1, %v836_v59, 0.0  ;;  %v447_v61 = vpack.c.bf16 %v836_v59, %v836_v59 }
 0x194   : > { %440 = vadd.xlane.f32.xlu0 %v439_v60 }
 0x195   : > { %812 = vmatmul.mubr.msk.bf16.vlgmr.msra.gmra.mrb[12].mxu0 %vm224_vm1, %v447_v61 }
 0x196   : > { %v838_v62 = vpop.eup %837 }
 0x197   : > { %v442_v63 = vsel %vm224_vm1, %v838_v62, 0.0  ;;  %v448_v1 = vpack.c.bf16 %v838_v62, %v838_v62 }
 0x198   : > { %443 = vadd.xlane.f32.xlu1 %v442_v63 }
 0x199   : > { %818 = vmatmul.mubr.msk.bf16.vlgmr.msra.gmra.mrb[12].mxu1 %vm224_vm1, %v448_v1 }
 0x219   : > { %v435_v2 = vpop.xlane.xlu0 %434 }
 0x21a   : > { %839 = vrcp.f32 %v435_v2 }
 0x21d   : > { %v438_v3 = vpop.xlane.xlu1 %437 }
 0x21e   : > { %841 = vrcp.f32 %v438_v3 }
 0x221   : > { %v441_v4 = vpop.xlane.xlu0 %440 }
 0x222   : > { %843 = vrcp.f32 %v441_v4 }
 0x224   : > { %v840_v5 = vpop.eup %839 }
 0x225   : > { %v444_v0 = vpop.xlane.xlu1 %443 }
 0x226   : > { %845 = vrcp.f32 %v444_v0 }
 0x228   : > { %v842_v12 = vpop.eup %841 }
 0x22c   : > { %v844_v19 = vpop.eup %843 }
 0x230   : > { %v846_v26 = vpop.eup %845 }
 0x260   : > { %v490_v6 = vpop.f32.mrb[8].mxu0 }
 0x261   : > { %v635_v7 = vmul.f32 %v840_v5, %v490_v6  ;;  %v801_v8 = vpop.f32.mrb[9].mxu0 }
 0x262   : > { %v493_v9 = vpop.f32.mrb[10].mxu0 }
 0x263   : > { %v642_v10 = vpack.c.bf16 %v635_v7, %v635_v7  ;;  %v802_v11 = vpop.f32.mrb[11].mxu0 }
 0x264   : > { %v536_v13 = vpop.f32.mrb[8].mxu1 }
 0x265   : > { %647 = vst.msk [vmem:[%s210_s26] sm:$0xf] %vm646_vm3, %v642_v10  ;;  %v637_v14 = vmul.f32 %v842_v12, %v536_v13  ;;  %v807_v15 = vpop.f32.mrb[9].mxu1 }
 0x266   : > { %v539_v16 = vpop.f32.mrb[10].mxu1 }
 0x267   : > { %v643_v17 = vpack.c.bf16 %v637_v14, %v637_v14  ;;  %v808_v18 = vpop.f32.mrb[11].mxu1 }
 0x268   : > { %v582_v20 = vpop.f32.mrb[12].mxu0 }
 0x269   : > { %648 = vst.msk [vmem:[%s210_s26 + $0x4] sm:$0xf] %vm646_vm3, %v643_v17  ;;  %v639_v21 = vmul.f32 %v844_v19, %v582_v20  ;;  %v813_v22 = vpop.f32.mrb[13].mxu0 }
 0x26a   : > { %v585_v23 = vpop.f32.mrb[14].mxu0 }
 0x26b   : > { %v644_v24 = vpack.c.bf16 %v639_v21, %v639_v21  ;;  %v814_v25 = vpop.f32.mrb[15].mxu0 }
 0x26c   : > { %v628_v27 = vpop.f32.mrb[12].mxu1 }
 0x26d   : > { %649 = vst.msk [vmem:[%s210_s26 + $0x8] sm:$0xf] %vm646_vm3, %v644_v24  ;;  %v641_v28 = vmul.f32 %v846_v26, %v628_v27  ;;  %v819_v29 = vpop.f32.mrb[13].mxu1 }
 0x26e   : > { %v631_v30 = vpop.f32.mrb[14].mxu1 }
 0x26f   : > { %v645_v31 = vpack.c.bf16 %v641_v28, %v641_v28  ;;  %v820_v32 = vpop.f32.mrb[15].mxu1 }
 0x271   : > { %650 = vst.msk [vmem:[%s210_s26 + $0xc] sm:$0xf] %vm646_vm3, %v645_v31 }
 0x272 PF: > { %s13_s12 = sadd.s32 1, %s853_s12  }
 0x273   : > { %p10_p4 = scmp.ge.s32.totalorder %s13_s12, 4  }
 0x275   :  { %12 = sbr.rel (!%p10_p4) target bundleno = 1 (0x1), region = 68 }

// kernel: transformer_forward.8
= control target key start
LH: loop header
LB: loop body
LE: loop exit
PB: predicated region body
PF: predicated region fallthrough
CT: control target
= control target key end

     0   :  { %v465_v0 = vmov 0.0   ;;  %vm466_vm0 = vmmov 0   ;;  %vm68_vm1 = vcmask 261120   ;;  %s621_s2 = inlined_call_operand.vmem [shape: bf16[32,32], index: 2, kind: input, shape index: {}]   ;;  %s622_s1 = inlined_call_operand.vmem [shape: bf16[16,32], index: 1, kind: input, shape index: {}]   ;;  %s623_s3 = inlined_call_operand.vmem [shape: f32[1,32], index: 3, kind: input, shape index: {}]   ;;  %s624_s0 = inlined_call_operand.vmem [shape: f32[16,32], index: 0, kind: input, shape index: {}]   ;;  %s625_s6 = inlined_call_operand.vmem [shape: bf16[32,128], index: 6, kind: input, shape index: {}]   ;;  %s626_s4 = inlined_call_operand.vmem [shape: f32[1,32], index: 4, kind: input, shape index: {}]   ;;  %s627_s5 = inlined_call_operand.vmem [shape: f32[1,32], index: 5, kind: input, shape index: {}]   ;;  %s628_s8 = inlined_call_operand.vmem [shape: bf16[128,32], index: 8, kind: input, shape index: {}]   ;;  %s629_s7 = inlined_call_operand.vmem [shape: f32[1,128], index: 7, kind: input, shape index: {}]   ;;  %s630_s9 = inlined_call_operand.vmem [shape: f32[1,32], index: 9, kind: input, shape index: {}]   ;;  %s631_s10 = inlined_call_operand.vmem [shape: f32[16,32], index: 10, kind: output, shape index: {}]  }
   0x1   :  { %402 = vmatprep.subr.bf16.mxu1 %v465_v0  ;;  %v440_v1 = vld [vmem:[%s621_s2] sm:$0xff]   ;;  %406 = vmatprep.mubr.msk.bf16.mxu1 %vm466_vm0, %v465_v0  ;;  %v441_v2 = vld [vmem:[%s621_s2 + $0x8] sm:$0xff]   ;;  %v447_v48 = vld [vmem:[%s628_s8 + $0x10] sm:$0xff]  }
   0x2   :  { %418 = vmatprep.subr.bf16.mxu0 %v465_v0  ;;  %434 = vmatprep.mubr.msk.bf16.mxu0 %vm466_vm0, %v465_v0  ;;  %v442_v3 = vld [vmem:[%s622_s1] sm:$0xff]   ;;  %v37_v9 = vld [vmem:[%s624_s0 + $0x8] sm:$0xff]  ;;  %v448_v49 = vld [vmem:[%s628_s8 + $0x18] sm:$0xff]  }
   0x3   :  { %403 = vmatpush3.bf16.msra.mxu1 %v440_v1  ;;  %v365_v4 = vld [vmem:[%s623_s3] ss:$0 sm:$0xff]  ;;  %v444_v28 = vld [vmem:[%s625_s6 + $0x8] sm:$0xff]   ;;  %v451_v52 = vld [vmem:[%s628_s8 + $0x30] sm:$0xff]  }
   0x4   :  { %404 = vmatprep.subr.bf16.mxu1 %v465_v0  ;;  %v36_v5 = vld [vmem:[%s624_s0] sm:$0xff]  ;;  %v446_v47 = vld [vmem:[%s628_s8 + $0x8] sm:$0xff]   ;;  %v452_v53 = vld [vmem:[%s628_s8 + $0x38] sm:$0xff]  }
   0x5   :  { %v443_v27 = vld [vmem:[%s625_s6] sm:$0xff]   ;;  %v450_v51 = vld [vmem:[%s628_s8 + $0x28] sm:$0xff]  }
   0x6   :  { %v370_v37 = vld [vmem:[%s626_s4] ss:$0 sm:$0xff] }
   0x7   :  { %405 = vmatpush3.bf16.msra.mxu1 %v441_v2  ;;  %v371_v41 = vld [vmem:[%s627_s5] ss:$0 sm:$0xff] }
   0x8   :  { %410 = vmatprep.subr.bf16.mxu1 %v465_v0  ;;  %v445_v46 = vld [vmem:[%s628_s8] sm:$0xff]  }
   0x9   :  { %419 = vmatpush3.bf16.msra.mxu0 %v445_v46  ;;  %v449_v50 = vld [vmem:[%s628_s8 + $0x20] sm:$0xff]  }
   0xa   :  { %407 = vmatmul.mubr.msk.bf16.vlgmr.msra.gmra.mrb[0].mxu1 %vm68_vm1, %v442_v3  ;;  %420 = vmatprep.subr.bf16.mxu0 %v465_v0  ;;  %v372_v54 = vld [vmem:[%s629_s7] ss:$0 sm:$0xff] }
   0xb   :  { %414 = vmatprep.mubr.msk.bf16.mxu1 %vm466_vm0, %v465_v0  ;;  %411 = vmatpush3.bf16.msra.mxu1 %v443_v27 }
   0xc   :  { %412 = vmatprep.subr.bf16.mxu1 %v465_v0 }
   0xd   :  { %421 = vmatpush3.bf16.msra.mxu0 %v446_v47 }
   0xe   :  { %422 = vmatprep.subr.bf16.mxu0 %v465_v0 }
   0xf   :  { %413 = vmatpush3.bf16.msra.mxu1 %v444_v28 }
  0x11   :  { %423 = vmatpush3.bf16.msra.mxu0 %v447_v48 }
  0x12   :  { %424 = vmatprep.subr.bf16.mxu0 %v465_v0 }
  0x15   :  { %425 = vmatpush3.bf16.msra.mxu0 %v448_v49 }
  0x16   :  { %426 = vmatprep.subr.bf16.mxu0 %v465_v0 }
  0x19   :  { %427 = vmatpush3.bf16.msra.mxu0 %v449_v50 }
  0x1a   :  { %428 = vmatprep.subr.bf16.mxu0 %v465_v0 }
  0x1d   :  { %429 = vmatpush3.bf16.msra.mxu0 %v450_v51 }
  0x1e   :  { %430 = vmatprep.subr.bf16.mxu0 %v465_v0 }
  0x21   :  { %431 = vmatpush3.bf16.msra.mxu0 %v451_v52 }
  0x22   :  { %432 = vmatprep.subr.bf16.mxu0 %v465_v0 }
  0x25   :  { %433 = vmatpush3.bf16.msra.mxu0 %v452_v53 }
  0xdd   :  { %v106_v6 = vpop.f32.mrb[0].mxu1 }
  0xde   :  { %v107_v7 = vadd.f32 %v365_v4, %v106_v6  ;;  %v408_v8 = vpop.f32.mrb[1].mxu1 }
  0xdf   :  { %v109_v10 = vpop.f32.mrb[2].mxu1 }
  0xe0   :  { %v548_v11 = vadd.f32 %v107_v7, %v36_v5  ;;  %v110_v12 = vadd.f32 %v365_v4, %v109_v10  ;;  %v409_v13 = vpop.f32.mrb[3].mxu1  ;;  %v378_v10 = vld [vmem:[%s630_s9] ss:$0 sm:$0xff] }
  0xe2   :  { %v550_v14 = vadd.f32 %v110_v12, %v37_v9  ;;  %v117_v15 = vsel %vm68_vm1, %v548_v11, 0.0 }
  0xe3   :  { %118 = vadd.xlane.f32.xlu0 %v117_v15 }
  0xe4   :  { %v120_v16 = vsel %vm68_vm1, %v550_v14, 0.0 }
  0xe7   :  { %121 = vadd.xlane.f32.xlu0 %v120_v16 }
 0x170   :  { %v119_v17 = vpop.xlane.xlu0 %118 }
 0x171   :  { %v124_v18 = vmul.f32 0.03125, %v119_v17 }
 0x173   :  { %v126_v19 = vsub.f32 %v548_v11, %v124_v18 }
 0x174   :  { %v122_v20 = vpop.xlane.xlu0 %121 }
 0x175   :  { %v125_v21 = vmul.f32 0.03125, %v122_v20  ;;  %v128_v22 = vmul.f32 %v126_v19, %v126_v19 }
 0x177   :  { %v127_v23 = vsub.f32 %v550_v14, %v125_v21  ;;  %v130_v24 = vsel %vm68_vm1, %v128_v22, 0.0 }
 0x178   :  { %131 = vadd.xlane.f32.xlu1 %v130_v24 }
 0x179   :  { %v129_v25 = vmul.f32 %v127_v23, %v127_v23 }
 0x17b   :  { %v133_v26 = vsel %vm68_vm1, %v129_v25, 0.0 }
 0x17c   :  { %134 = vadd.xlane.f32.xlu1 %v133_v26 }
 0x205   :  { %v132_v29 = vpop.xlane.xlu1 %131 }
 0x206   :  { %v136_v30 = vmul.f32 0.03125, %v132_v29 }
 0x208   :  { %v138_v31 = vadd.f32 1e-05, %v136_v30 }
 0x209   :  { %v135_v32 = vpop.xlane.xlu1 %134 }
 0x20a   :  { %453 = vrsqrt.f32 %v138_v31  ;;  %v137_v33 = vmul.f32 0.03125, %v135_v32 }
 0x20c   :  { %v139_v34 = vadd.f32 1e-05, %v137_v33 }
 0x20e   :  { %455 = vrsqrt.f32 %v139_v34 }
 0x214   :  { %v454_v35 = vpop.eup %453 }
 0x215   :  { %v142_v36 = vmul.f32 %v454_v35, %v126_v19 }
 0x217   :  { %v150_v39 = vmul.f32 %v370_v37, %v142_v36 }
 0x218   :  { %v456_v38 = vpop.eup %455 }
 0x219   :  { %v143_v40 = vmul.f32 %v456_v38, %v127_v23  ;;  %v158_v43 = vadd.f32 %v371_v41, %v150_v39 }
 0x21b   :  { %v151_v42 = vmul.f32 %v370_v37, %v143_v40 }
 0x21d   :  { %v159_v44 = vadd.f32 %v371_v41, %v151_v42 }
 0x21f   :  { %v160_v45 = vpack.c.bf16 %v159_v44, %v158_v43 }
 0x221   :  { %415 = vmatmul.mubr.msk.bf16.vlgmr.msra.gmra.mrb[4].mxu1 %vm68_vm1, %v160_v45 }
 0x2f4   :  { %v221_v55 = vpop.f32.mrb[4].mxu1 }
 0x2f5   :  { %v222_v56 = vadd.f32 %v372_v54, %v221_v55  ;;  %v416_v57 = vpop.f32.mrb[5].mxu1 }
 0x2f6   :  { %v224_v58 = vpop.f32.mrb[6].mxu1 }
 0x2f7   :  { %v376_v59 = vmul.f32 -1.702, %v222_v56  ;;  %v225_v60 = vadd.f32 %v372_v54, %v224_v58  ;;  %v417_v61 = vpop.f32.mrb[7].mxu1 }
 0x2f9   :  { %v232_v62 = vmul.f32 1.442695, %v376_v59  ;;  %v377_v63 = vmul.f32 -1.702, %v225_v60 }
 0x2fb   :  { %457 = vpow2.f32 %v232_v62  ;;  %v234_v0 = vmul.f32 1.442695, %v377_v63 }
 0x2fd   :  { %459 = vpow2.f32 %v234_v0 }
 0x305   :  { %v458_v1 = vpop.eup %457 }
 0x306   :  { %v236_v2 = vadd.f32 1.0, %v458_v1 }
 0x307   :  { %v460_v3 = vpop.eup %459 }
 0x308   :  { %461 = vrcp.f32 %v236_v2  ;;  %v237_v4 = vadd.f32 1.0, %v460_v3 }
 0x30a   :  { %463 = vrcp.f32 %v237_v4 }
 0x312   :  { %v462_v5 = vpop.eup %461 }
 0x313   :  { %v242_v7 = vmul.f32 %v462_v5, %v222_v56 }
 0x314   :  { %v464_v6 = vpop.eup %463 }
 0x315   :  { %v243_v8 = vmul.f32 %v464_v6, %v225_v60 }
 0x317   :  { %v244_v9 = vpack.c.bf16 %v243_v8, %v242_v7 }
 0x319   :  { %435 = vmatmul.mubr.bf16.vlgmr.msra.gmra.mrb[0].mxu0 %v244_v9 }
 0x3ec   :  { %v350_v12 = vpop.f32.mrb[0].mxu0 }
 0x3ed   :  { %v351_v13 = vadd.f32 %v378_v10, %v350_v12  ;;  %v436_v15 = vpop.f32.mrb[1].mxu0 }
 0x3ee   :  { %v353_v16 = vpop.f32.mrb[2].mxu0 }
 0x3ef   :  { %v357_v17 = vadd.f32 %v351_v13, %v548_v11  ;;  %v354_v18 = vadd.f32 %v378_v10, %v353_v16  ;;  %v437_v19 = vpop.f32.mrb[3].mxu0 }
 0x3f1   :  { %359 = vst.msk [vmem:[%s631_s10] sm:$0xff] %vm68_vm1, %v357_v17  ;;  %v358_v20 = vadd.f32 %v354_v18, %v550_v14 }
 0x3f3   :  { %360 = vst.msk [vmem:[%s631_s10 + $0x8] sm:$0xff] %vm68_vm1, %v358_v20 }

</bundles_post_ra>
